<compile_context>
chip_gen: v5e
topology: v5e:2x2
jax: 0.10.0
libtpu: 0.0.40
codegen_flags: <defaults>
</compile_context>

<pallas_src>
import functools

import jax
import jax.numpy as jnp
import numpy as np
from jax import lax
from jax.experimental import pallas as pl
from jax.experimental.pallas import tpu as pltpu


def _phase_taps(K, s, p, dim_in, dim_out):
    """Phase-decomposition metadata along one spatial dim.

    For output index o = s*q + r, the contributing kernel taps k satisfy
    k ≡ (r + p) (mod s) and the input index is i = q + d, d = (r + p - k)//s.
    Returns (taps, t, pad_lo, pad_hi, q_len) where taps[r] is a list of
    (k_or_None, d) of uniform length t (None = exact-zero dummy tap) and
    pad_lo/pad_hi pad the input so every window [d+pad_lo : d+pad_lo+q_len]
    is in bounds (out-of-range reads land in the zero padding).
    """
    q_len = -(-dim_out // s)  # ceil(dim_out / s)
    taps = []
    for r in range(s):
        taps.append([(k, (r + p - k) // s) for k in range(K)
                     if (r + p - k) % s == 0])
    all_d = [d for tl in taps for (_, d) in tl]
    d_min = min(all_d) if all_d else 0
    d_max = max(all_d) if all_d else 0
    pad_lo = max(0, -d_min)
    pad_hi = max(0, q_len + d_max - dim_in)
    t = max(1, max(len(tl) for tl in taps))
    taps = [tl + [(None, d_max)] * (t - len(tl)) for tl in taps]
    return taps, t, pad_lo, pad_hi, q_len


def _deconv_fused_kernel(x_ref, w_ref, b_ref, o_ref, *, apply_relu):
    # x_ref: (nph*T, N*HWq) bf16   stacked phase-im2col columns
    # w_ref: (nph*Cout, nph*T) bf16 block-diagonal packed weights
    # b_ref: (nph*Cout, 1) f32
    # o_ref: (nph*Cout, N*HWq)     lane-dense output (all phases, all batches)
    acc = jnp.dot(w_ref[...], x_ref[...], preferred_element_type=jnp.float32)
    acc = acc + b_ref[...]                      # broadcast over lanes
    if apply_relu:
        acc = jnp.maximum(acc, 0.0)
    o_ref[...] = acc.astype(o_ref.dtype)


def deconv_forward(x_nchw, weight, bias, *, kernel_size, stride, act=None):
    """Forward pass of Deconv (batch_norm=False, p_dropout=0.0).

    x_nchw: (N, Cin, H, W); weight: (Cin, Cout, K, K) [PyTorch ConvTranspose2d
    layout]; bias: (Cout,).  Returns (N, Cout, Ho, Wo) in NCHW.
    """
    # TODO(synk): batch_norm / dropout branches of the module are unused in
    # this configuration (batch_norm=False, p_dropout=0.0) and not implemented.
    if act is None:
        apply_relu = False
    elif act in ("relu", "ReLU"):
        apply_relu = True
    else:
        raise NotImplementedError(f"activation {act!r} not supported")

    N, Cin, H, W = x_nchw.shape
    K, s = kernel_size, stride
    # Matches the module's own Python-level `round(kernel_size / 2 - 1)`
    # (note: banker's rounding for odd K; do not swap for floor-based padding).
    p = round(K / 2 - 1)
    Cout = weight.shape[1]
    Ho = (H - 1) * s - 2 * p + K
    Wo = (W - 1) * s - 2 * p + K

    taps_h, th, plh, phh, Hq = _phase_taps(K, s, p, H, Ho)
    taps_w, tw, plw, phw, Wq = _phase_taps(K, s, p, W, Wo)
    T = th * tw * Cin
    HWq = Hq * Wq
    nph = s * s
    M = nph * Cout          # fused matmul rows          (32 here)
    Kc = nph * T            # fused contraction depth    (64 here; mult of 16)
    L = N * HWq             # fused lane extent          (512 here; mult of 128)

    # Single small pad of the *un-dilated* input; cast to bf16 up front so the
    # im2col stacking already moves half the bytes.
    xp = jnp.pad(x_nchw, ((0, 0), (0, 0), (plh, phh), (plw, phw)))
    xp = xp.astype(jnp.bfloat16)

    # --- Fused phase-im2col: s*th + s*tw static slices + 2 stacks + 1
    # transpose/reshape (no general gather HLO, no per-tap concat storm). ---
    h_off = [dh + plh for r in range(s) for (_, dh) in taps_h[r]]   # (rh, a)
    w_off = [dw + plw for r in range(s) for (_, dw) in taps_w[r]]   # (rw, b)

    rows = jnp.stack([xp[:, :, o:o + Hq, :] for o in h_off], axis=2)
    #   (N, Cin, s*th, Hq, Wp)
    cols = jnp.stack([rows[..., o:o + Wq] for o in w_off], axis=4)
    #   (N, Cin, s*th, Hq, s*tw, Wq)
    g = cols.reshape(N, Cin, s, th, Hq, s, tw, Wq)
    # rows of x_col = (rh, rw, a, b, c) phase-major; cols = (n, qh, qw).
    x_col = jnp.transpose(g, (2, 5, 3, 6, 1, 0, 4, 7)).reshape(Kc, L)

    # --- Block-diagonal packed weights: phase ph occupies rows
    # [ph*Cout, (ph+1)*Cout) and columns [ph*T, (ph+1)*T).  Dummy taps get
    # exact-zero weights (stay exactly zero; no quantized path here). ---
    w_cols = []
    for rh in range(s):
        for rw in range(s):
            wts = []
            for (kh, _) in taps_h[rh]:
                for (kw, _) in taps_w[rw]:
                    if kh is None or kw is None:
                        wts.append(jnp.zeros((Cout, Cin), weight.dtype))
                    else:
                        wts.append(weight[:, :, kh, kw].T)       # (Cout, Cin)
            w_cols.append(jnp.concatenate(wts, axis=1))          # (Cout, T)
    w_bd = jnp.zeros((M, Kc), weight.dtype)
    for ph, wc in enumerate(w_cols):
        w_bd = w_bd.at[ph * Cout:(ph + 1) * Cout,
                       ph * T:(ph + 1) * T].set(wc)
    w_bd = w_bd.astype(jnp.bfloat16)

    b_col = jnp.tile(bias, nph).reshape(M, 1).astype(jnp.float32)

    # Single grid step: x_col (64 KiB bf16), w_bd (4 KiB), bias and the
    # (M, L) output all stay VMEM-resident — far below even v7x's 64 MiB
    # physical / 32 MiB default scoped VMEM, so no vmem_limit override needed.
    out = pl.pallas_call(
        functools.partial(_deconv_fused_kernel, apply_relu=apply_relu),
        out_shape=jax.ShapeDtypeStruct((M, L), x_nchw.dtype),
        grid=(1,),
        in_specs=[
            pl.BlockSpec((Kc, L), lambda i: (0, 0)),
            pl.BlockSpec((M, Kc), lambda i: (0, 0)),
            pl.BlockSpec((M, 1), lambda i: (0, 0)),
        ],
        out_specs=pl.BlockSpec((M, L), lambda i: (0, 0)),
        compiler_params=pltpu.CompilerParams(
            dimension_semantics=("arbitrary",)),
    )(x_col, w_bd, b_col)

    # Rows = (rh*s + rw)*Cout + co; cols = n*HWq + qh*Wq + qw.
    # Interleave phases back into NCHW with one cheap XLA transpose (~64 KiB).
    out = out.reshape(s, s, Cout, N, Hq, Wq)
    out = jnp.transpose(out, (3, 2, 4, 0, 5, 1)).reshape(
        N, Cout, Hq * s, Wq * s)
    return out[:, :, :Ho, :Wo]


def deconv_reference(x_nchw, weight, bias, *, kernel_size, stride):
    """Pure-JAX ground-truth reference for ConvTranspose2d (HIGHEST precision)."""
    K = kernel_size
    pad = round(K / 2 - 1)
    # (Cin, Cout, K, K) -> flipped OIHW (Cout, Cin, K, K)
    w = jnp.transpose(jnp.flip(weight, axis=(2, 3)), (1, 0, 2, 3))
    y = lax.conv_general_dilated(
        x_nchw, w,
        window_strides=(1, 1),
        padding=[(K - 1 - pad, K - 1 - pad)] * 2,
        lhs_dilation=(stride, stride),
        dimension_numbers=("NCHW", "OIHW", "NCHW"),
        precision=lax.Precision.HIGHEST)
    return y + bias.reshape(1, -1, 1, 1)


if __name__ == "__main__":
    # Module config: Deconv(in_channels=4, out_channels=8, kernel_size=4,
    #                       stride=2, act=None, batch_norm=False)
    in_channels, out_channels, kernel_size, stride = 4, 8, 4, 2
    N, H, W = 2, 16, 16

    key = jax.random.PRNGKey(0)
    kx, kw, kb = jax.random.split(key, 3)

    x = jax.random.normal(kx, (N, in_channels, H, W), jnp.float32)

    # Deterministic PyTorch-style init: U(-b, b), b = 1/sqrt(fan_in)
    fan_in = in_channels * kernel_size * kernel_size
    bound = 1.0 / np.sqrt(fan_in)
    weight = jax.random.uniform(
        kw, (in_channels, out_channels, kernel_size, kernel_size),
        jnp.float32, minval=-bound, maxval=bound)
    bias = jax.random.uniform(
        kb, (out_channels,), jnp.float32, minval=-bound, maxval=bound)

    out = deconv_forward(x, weight, bias,
                         kernel_size=kernel_size, stride=stride, act=None)
    out = jax.block_until_ready(out)

    ref = deconv_reference(x, weight, bias,
                           kernel_size=kernel_size, stride=stride)
    ref = jax.block_until_ready(ref)

    Ho = (H - 1) * stride - 2 * round(kernel_size / 2 - 1) + kernel_size
    Wo = (W - 1) * stride - 2 * round(kernel_size / 2 - 1) + kernel_size
    assert out.shape == (N, out_channels, Ho, Wo)

    # bf16 operand contract (matches DEFAULT MXU precision); reference is the
    # HIGHEST-precision f32 path, so allow bf16-level error.  A 1e-2 tolerance
    # (values ~0.4, contraction depth 16) still catches any indexing bug.
    np.testing.assert_allclose(np.asarray(out), np.asarray(ref),
                               rtol=1e-2, atol=1e-2)

    print("KERNEL_OK")
</pallas_src>

<mosaic_0001>
module attributes {stable_mosaic.version = 11 : i64} {
  func.func @_deconv_fused_kernel(%arg0: i32, %arg1: memref<64x512xbf16, #tpu.memory_space<vmem>>, %arg2: memref<32x64xbf16, #tpu.memory_space<vmem>>, %arg3: memref<32x1xf32, #tpu.memory_space<vmem>>, %arg4: memref<32x512xf32, #tpu.memory_space<vmem>>) attributes {dimension_semantics = [#tpu.dimension_semantics<arbitrary>], iteration_bounds = array<i64: 1>, scalar_prefetch = 0 : i64, scratch_operands = 0 : i64, tpu.core_type = #tpu.core_type<tc>, window_params = [{pipeline_mode = #tpu.pipeline_mode<synchronous>, transform_indices = @transform_0, window_bounds = array<i64: 64, 512>}, {pipeline_mode = #tpu.pipeline_mode<synchronous>, transform_indices = @transform_1, window_bounds = array<i64: 32, 64>}, {pipeline_mode = #tpu.pipeline_mode<synchronous>, transform_indices = @transform_2, window_bounds = array<i64: 32, 1>}, {pipeline_mode = #tpu.pipeline_mode<synchronous>, transform_indices = @transform_3, window_bounds = array<i64: 32, 512>}]} {
    %c0 = arith.constant 0 : index
    %c0_0 = arith.constant 0 : index
    %0 = vector.load %arg2[%c0, %c0_0] : memref<32x64xbf16, #tpu.memory_space<vmem>>, vector<32x64xbf16>
    %c0_1 = arith.constant 0 : index
    %c0_2 = arith.constant 0 : index
    %1 = vector.load %arg1[%c0_1, %c0_2] : memref<64x512xbf16, #tpu.memory_space<vmem>>, vector<64x512xbf16>
    %cst = arith.constant dense<0.000000e+00> : vector<32x512xf32>
    %2 = tpu.matmul %0, %1, %cst {dimension_numbers = #tpu.dot_dimension_numbers<[1], [0], [0], [1], [0, 0, 1, 1], [], []>} : vector<32x64xbf16>, vector<64x512xbf16>, vector<32x512xf32> -> vector<32x512xf32>
    %c0_3 = arith.constant 0 : index
    %c0_4 = arith.constant 0 : index
    %3 = vector.load %arg3[%c0_3, %c0_4] : memref<32x1xf32, #tpu.memory_space<vmem>>, vector<32x1xf32>
    %4 = vector.broadcast %3 : vector<32x1xf32> to vector<32x512xf32>
    %5 = arith.addf %2, %4 : vector<32x512xf32>
    %c0_5 = arith.constant 0 : index
    %c0_6 = arith.constant 0 : index
    %6 = vector.load %arg4[%c0_5, %c0_6] : memref<32x512xf32, #tpu.memory_space<vmem>>, vector<32x512xf32>
    tpu.vector_store %arg4[%c0_5, %c0_6], %5 {strides = array<i32>} : memref<32x512xf32, #tpu.memory_space<vmem>>, vector<32x512xf32>,
    return
  }
  func.func @transform_0(%arg0: i32) -> (i32, i32) {
    %c0_i32 = arith.constant 0 : i32
    %c0_i32_0 = arith.constant 0 : i32
    %c0_i32_1 = arith.constant 0 : i32
    return %c0_i32, %c0_i32_0 : i32, i32
  }
  func.func @transform_1(%arg0: i32) -> (i32, i32) {
    %c0_i32 = arith.constant 0 : i32
    %c0_i32_0 = arith.constant 0 : i32
    %c0_i32_1 = arith.constant 0 : i32
    return %c0_i32, %c0_i32_0 : i32, i32
  }
  func.func @transform_2(%arg0: i32) -> (i32, i32) {
    %c0_i32 = arith.constant 0 : i32
    %c0_i32_0 = arith.constant 0 : i32
    %c0_i32_1 = arith.constant 0 : i32
    return %c0_i32, %c0_i32_0 : i32, i32
  }
  func.func @transform_3(%arg0: i32) -> (i32, i32) {
    %c0_i32 = arith.constant 0 : i32
    %c0_i32_0 = arith.constant 0 : i32
    %c0_i32_1 = arith.constant 0 : i32
    return %c0_i32, %c0_i32_0 : i32, i32
  }
}

</mosaic_0001>

<bundles_post_ra>
// kernel: tpu_custom_call.1
= control target key start
LH: loop header
LB: loop body
LE: loop exit
PB: predicated region body
PF: predicated region fallthrough
CT: control target
= control target key end

     0   :  { %8 = vsyncpa [#allocation3], 0  ;;  %s502_s0 = inlined_call_operand.hbm [shape: bf16[64,512], index: 0, kind: input, shape index: {}]   ;;  %s503_s1 = inlined_call_operand.vmem [shape: bf16[32,64], index: 1, kind: input, shape index: {}]   ;;  %s504_s2 = inlined_call_operand.vmem [shape: f32[32,1], index: 2, kind: input, shape index: {}]   ;;  %s505_s3 = inlined_call_operand.hbm [shape: f32[32,512], index: 3, kind: output, shape index: {}]  }
   0x1   :  { %9 = vsyncpa [#allocation4], 0  ;;  %s14_s14 = sshll.u32 %s502_s0, 4  ;;  %s443_s15 = smov [#allocation2]   ;;  %s15_s14 = int_to_ptr.hbm [resolvable:$true] %s14_s14 }
   0x2   :  { %s16_s16 = sshll.u32 %s443_s15, 4  ;;  %s444_s17 = smov 256   ;;  %s17_s16 = int_to_ptr.vmem [resolvable:$true] %s16_s16 }
   0x3   :  { %s445_s18 = smov 16  }
   0x4   :  { %22 = dma.hbm_to_vmem [thread:$0]  %s15_s14, 2048, %s17_s16, [#allocation3], %s444_s17, %s444_s17, %s445_s18  }
   0x5   :  { %439 = dma.done.wait [#allocation3], 2048  }
   0x6   :  { %440 = vsyncadd [#allocation3], 4294965248  ;;  %v446_v0 = vmov 0   ;;  %v342_v1 = vld [vmem:[#allocation2 + $0x60] sm:$0xf]  ;;  %v54_v49 = vld [vmem:[%s504_s2 + $0x10] sm:$0xff] }
   0x7   :  { %389 = vset.pattern.permute.xlu0 %v446_v0  ;;  %390 = vset.pattern.permute.xlu1 %v446_v0  ;;  %v380_v2 = vld [vmem:[#allocation2 + $0x6c] sm:$0xf0]  ;;  %v378_v3 = vld [vmem:[#allocation2 + $0x64] sm:$0xf]  ;;  %v344_v5 = vld [vmem:[#allocation2 + $0x70] sm:$0xf0] }
   0x8   :  { %v343_v4 = vor.u32 %v380_v2, %v342_v1  ;;  %v350_v6 = vld [vmem:[#allocation2 + $0x68] sm:$0xf]  ;;  %v381_v7 = vld [vmem:[#allocation2 + $0x74] sm:$0xf0]  ;;  %v347_v8 = vor.u32 %v378_v3, %v344_v5  ;;  %v379_v10 = vld [vmem:[#allocation2 + $0x6c] sm:$0xf]  ;;  %68 = vperm.xlu1 %390, %v54_v49  }
   0x9   :  { %v351_v9 = vor.u32 %v381_v7, %v350_v6  ;;  %v352_v11 = vld [vmem:[#allocation2 + $0x78] sm:$0xf0]  ;;  %v326_v12 = vld [vmem:[#allocation2 + $0x40] sm:$0xf]  ;;  %v376_v14 = vld [vmem:[#allocation2 + $0x4c] sm:$0xf0] }
   0xa   :  { %177 = vmatpush.bf16.msra.mxu0 %v343_v4  ;;  %v355_v13 = vor.u32 %v379_v10, %v352_v11  ;;  %v374_v15 = vld [vmem:[#allocation2 + $0x44] sm:$0xf]  ;;  %v328_v16 = vld [vmem:[#allocation2 + $0x50] sm:$0xf0]  ;;  %196 = vmatpush.bf16.msra.mxu1 %v347_v8  ;;  %v327_v17 = vor.u32 %v376_v14, %v326_v12  ;;  %v334_v19 = vld [vmem:[#allocation2 + $0x48] sm:$0xf] }
   0xb   :  { %215 = vmatpush.bf16.msra.mxu2 %v351_v9  ;;  %v331_v18 = vor.u32 %v374_v15, %v328_v16  ;;  %v377_v20 = vld [vmem:[#allocation2 + $0x54] sm:$0xf0]  ;;  %v375_v21 = vld [vmem:[#allocation2 + $0x4c] sm:$0xf]  ;;  %v336_v23 = vld [vmem:[#allocation2 + $0x58] sm:$0xf0] }
   0xc   :  { %234 = vmatpush.bf16.msra.mxu3 %v355_v13  ;;  %v335_v22 = vor.u32 %v377_v20, %v334_v19  ;;  %v310_v24 = vld [vmem:[#allocation2 + $0x20] sm:$0xf]  ;;  %v372_v25 = vld [vmem:[#allocation2 + $0x2c] sm:$0xf0]  ;;  %v339_v26 = vor.u32 %v375_v21, %v336_v23  ;;  %v370_v27 = vld [vmem:[#allocation2 + $0x24] sm:$0xf] }
   0xd   :  { %v312_v28 = vld [vmem:[#allocation2 + $0x30] sm:$0xf0]  ;;  %v318_v29 = vld [vmem:[#allocation2 + $0x28] sm:$0xf]  ;;  %v311_v30 = vor.u32 %v372_v25, %v310_v24  ;;  %v373_v31 = vld [vmem:[#allocation2 + $0x34] sm:$0xf0] }
   0xe   :  { %178 = vmatpush.bf16.msra.mxu0 %v327_v17  ;;  %v371_v32 = vld [vmem:[#allocation2 + $0x2c] sm:$0xf]  ;;  %v320_v33 = vld [vmem:[#allocation2 + $0x38] sm:$0xf0]  ;;  %197 = vmatpush.bf16.msra.mxu1 %v331_v18  ;;  %v315_v34 = vor.u32 %v370_v27, %v312_v28  ;;  %v319_v35 = vor.u32 %v373_v31, %v318_v29  ;;  %v294_v36 = vld [vmem:[#allocation2] sm:$0xf] }
   0xf   :  { %216 = vmatpush.bf16.msra.mxu2 %v335_v22  ;;  %v368_v37 = vld [vmem:[#allocation2 + $0xc] sm:$0xf0]  ;;  %v366_v38 = vld [vmem:[#allocation2 + $0x4] sm:$0xf]  ;;  %v323_v39 = vor.u32 %v371_v32, %v320_v33  ;;  %v296_v40 = vld [vmem:[#allocation2 + $0x10] sm:$0xf0] }
  0x10   :  { %235 = vmatpush.bf16.msra.mxu3 %v339_v26  ;;  %v302_v41 = vld [vmem:[#allocation2 + $0x8] sm:$0xf]  ;;  %v369_v42 = vld [vmem:[#allocation2 + $0x14] sm:$0xf0]  ;;  %v367_v43 = vld [vmem:[#allocation2 + $0xc] sm:$0xf]  ;;  %v295_v45 = vor.u32 %v368_v37, %v294_v36  ;;  %v299_v47 = vor.u32 %v366_v38, %v296_v40 }
  0x11   :  { %v304_v44 = vld [vmem:[#allocation2 + $0x18] sm:$0xf0]  ;;  %v52_v46 = vld [vmem:[%s504_s2] sm:$0xff]  ;;  %v303_v48 = vor.u32 %v369_v42, %v302_v41  ;;  %vm166_vm0 = vcmask 523264   ;;  %v53_v52 = vld [vmem:[%s504_s2 + $0x8] sm:$0xff]  ;;  %s271_s5 = sshll.u32 %s505_s3, 4  ;;  %s272_s5 = int_to_ptr.hbm [resolvable:$true] %s271_s5 }
  0x12   :  { %179 = vmatpush.bf16.msra.mxu0 %v311_v30  ;;  %198 = vmatpush.bf16.msra.mxu1 %v315_v34  ;;  %v307_v50 = vor.u32 %v367_v43, %v304_v44  ;;  %v364_v51 = vld [vmem:[%s503_s1] sm:$0xff]  ;;  %v55_v53 = vld [vmem:[%s504_s2 + $0x18] sm:$0xff]  ;;  %v365_v54 = vld [vmem:[%s503_s1 + $0x8] sm:$0xff]  ;;  %s447_s1 = smov [#allocation5]   ;;  %s448_s6 = smov 512  }
  0x13   :  { %217 = vmatpush.bf16.msra.mxu2 %v319_v35  ;;  %58 = vperm.xlu0 %389, %v52_v46   ;;  %s269_s2 = sshll.u32 %s447_s1, 4  ;;  %s449_s7 = smov 32   ;;  %s270_s2 = int_to_ptr.vmem [resolvable:$true] %s269_s2 }
  0x14   :  { %236 = vmatpush.bf16.msra.mxu3 %v323_v39  ;;  %73 = vperm.xlu1 %390, %v55_v53  }
  0x16   :  { %180 = vmatpush.bf16.msra.mxu0 %v295_v45  ;;  %199 = vmatpush.bf16.msra.mxu1 %v299_v47 }
  0x17   :  { %218 = vmatpush.bf16.msra.mxu2 %v303_v48 }
  0x18   :  { %237 = vmatpush.bf16.msra.mxu3 %v307_v50 }
  0x19   :  { %356 = vmatmul.msk.bf16.vlgmr.msra.gmra.mxu0 %vm166_vm0, %v364_v51  ;;  %358 = vmatmul.msk.bf16.vlgmr.msra.gmra.mxu1 %vm166_vm0, %v364_v51 }
  0x1a   :  { %360 = vmatmul.msk.bf16.vlgmr.msra.gmra.mxu2 %vm166_vm0, %v364_v51 }
  0x1b   :  { %362 = vmatmul.msk.bf16.vlgmr.msra.gmra.mxu3 %vm166_vm0, %v364_v51  ;;  %63 = vperm.xlu0 %389, %v53_v52  }
  0x29   :  { %357 = vmatmul.msk.bf16.gmra.mxu0 %vm166_vm0, %v365_v54  ;;  %359 = vmatmul.msk.bf16.gmra.mxu1 %vm166_vm0, %v365_v54 }
  0x2a   :  { %361 = vmatmul.msk.bf16.gmra.mxu2 %vm166_vm0, %v365_v54 }
  0x2b   :  { %363 = vmatmul.msk.bf16.gmra.mxu3 %vm166_vm0, %v365_v54 }
  0x7a   :  { %v69_v5 = vpop.permute.xlu1 %68 }
  0x85   :  { %v59_v55 = vpop.permute.xlu0 %58 }
  0x86   :  { %v74_v14 = vpop.permute.xlu1 %73 }
  0x8d   :  { %v64_v60 = vpop.permute.xlu0 %63 }
  0x96   :  { %v182_v56 = vpop.f32.mrf.mxu0  ;;  %v201_v58 = vpop.f32.mrf.mxu1 }
  0x97   :  { %v183_v57 = vadd.f32 %v182_v56, %v59_v55  ;;  %v202_v59 = vadd.f32 %v201_v58, %v59_v55 }
  0x99   :  { %249 = vst [vmem:[#allocation5] sm:$0xff] %v183_v57 }
  0x9a   :  { %250 = vst [vmem:[#allocation5 + $0x8] sm:$0xff] %v202_v59 }
  0x9d   :  { %v220_v61 = vpop.f32.mrf.mxu2 }
  0x9e   :  { %v221_v62 = vadd.f32 %v220_v61, %v59_v55  ;;  %v239_v63 = vpop.f32.mrf.mxu3  ;;  %v184_v0 = vpop.f32.mrf.mxu0 }
  0x9f   :  { %v240_v1 = vadd.f32 %v239_v63, %v59_v55  ;;  %v185_v2 = vadd.f32 %v184_v0, %v64_v60  ;;  %v203_v3 = vpop.f32.mrf.mxu1 }
  0xa0   :  { %251 = vst [vmem:[#allocation5 + $0x10] sm:$0xff] %v221_v62  ;;  %v204_v4 = vadd.f32 %v203_v3, %v64_v60 }
  0xa1   :  { %252 = vst [vmem:[#allocation5 + $0x18] sm:$0xff] %v240_v1 }
  0xa2   :  { %253 = vst [vmem:[#allocation5 + $0x20] sm:$0xff] %v185_v2 }
  0xa3   :  { %254 = vst [vmem:[#allocation5 + $0x28] sm:$0xff] %v204_v4 }
  0xa5   :  { %v222_v6 = vpop.f32.mrf.mxu2 }
  0xa6   :  { %v223_v7 = vadd.f32 %v222_v6, %v64_v60  ;;  %v241_v8 = vpop.f32.mrf.mxu3  ;;  %v187_v9 = vpop.f32.mrf.mxu0 }
  0xa7   :  { %v242_v10 = vadd.f32 %v241_v8, %v64_v60  ;;  %v188_v11 = vadd.f32 %v187_v9, %v69_v5  ;;  %v206_v12 = vpop.f32.mrf.mxu1 }
  0xa8   :  { %255 = vst [vmem:[#allocation5 + $0x30] sm:$0xff] %v223_v7  ;;  %v207_v13 = vadd.f32 %v206_v12, %v69_v5 }
  0xa9   :  { %256 = vst [vmem:[#allocation5 + $0x38] sm:$0xff] %v242_v10 }
  0xaa   :  { %257 = vst [vmem:[#allocation5 + $0x40] sm:$0xff] %v188_v11 }
  0xab   :  { %258 = vst [vmem:[#allocation5 + $0x48] sm:$0xff] %v207_v13 }
  0xad   :  { %v225_v15 = vpop.f32.mrf.mxu2 }
  0xae   :  { %v226_v16 = vadd.f32 %v225_v15, %v69_v5  ;;  %v244_v17 = vpop.f32.mrf.mxu3  ;;  %v189_v18 = vpop.f32.mrf.mxu0 }
  0xaf   :  { %v245_v19 = vadd.f32 %v244_v17, %v69_v5  ;;  %v190_v20 = vadd.f32 %v189_v18, %v74_v14  ;;  %v208_v21 = vpop.f32.mrf.mxu1 }
  0xb0   :  { %259 = vst [vmem:[#allocation5 + $0x50] sm:$0xff] %v226_v16  ;;  %v209_v22 = vadd.f32 %v208_v21, %v74_v14 }
  0xb1   :  { %260 = vst [vmem:[#allocation5 + $0x58] sm:$0xff] %v245_v19 }
  0xb2   :  { %261 = vst [vmem:[#allocation5 + $0x60] sm:$0xff] %v190_v20 }
  0xb3   :  { %262 = vst [vmem:[#allocation5 + $0x68] sm:$0xff] %v209_v22 }
  0xb5   :  { %v227_v23 = vpop.f32.mrf.mxu2 }
  0xb6   :  { %v228_v24 = vadd.f32 %v227_v23, %v74_v14  ;;  %v246_v25 = vpop.f32.mrf.mxu3 }
  0xb7   :  { %v247_v26 = vadd.f32 %v246_v25, %v74_v14 }
  0xb8   :  { %263 = vst [vmem:[#allocation5 + $0x70] sm:$0xff] %v228_v24 }
  0xb9   :  { %264 = vst [vmem:[#allocation5 + $0x78] sm:$0xff] %v247_v26 }
  0xba   :  { %277 = dma.vmem_to_hbm [thread:$0]  %s270_s2, 2048, %s272_s5, [#allocation4], %s448_s6, %s448_s6, %s449_s7  }
  0xbb   :  { %441 = dma.done.wait [#allocation4], 2048  }
  0xbc   :  { %442 = vsyncadd [#allocation4], 4294965248 }
  0xbd   :  { %282 = vsyncpa [#allocation3], 1 }
  0xbe   :  { %283 = vsyncpa [#allocation4], 1 }

</bundles_post_ra>
